<compile_context>
chip_gen: v5e
topology: v5e:2x2
jax: 0.10.0
libtpu: 0.0.40
codegen_flags: <defaults>
</compile_context>

<pallas_src>
import functools

import numpy as np
import jax
import jax.numpy as jnp
from jax.experimental import pallas as pl
from jax.experimental.pallas import tpu as pltpu


# ----------------------------------------------------------------------------
# Host-side glue: exact replication of P_MIL.extract_roi_features
# (torchvision.ops.roi_align on a [1, D, T, 1] feature map, aligned=False,
#  spatial_scale=1.0, sampling_ratio=-1, output_size=(roi_size, 1)).
# ----------------------------------------------------------------------------
def _bilinear_1d(feature, y):
    T = feature.shape[0]
    if y < -1.0 or y > T:
        return np.zeros(feature.shape[1], np.float32)
    y = max(y, 0.0)
    y_low = int(y)
    if y_low >= T - 1:
        y_low = y_high = T - 1
        y = float(y_low)
    else:
        y_high = y_low + 1
    ly = y - y_low
    hy = 1.0 - ly
    return (hy * feature[y_low] + ly * feature[y_high]).astype(np.float32)


def _roi_align_1d(feature, starts, ends, pooled):
    # feature: [T, D] (already zero-padded), starts/ends: [M] extended bounds
    M, D = starts.shape[0], feature.shape[1]
    out = np.zeros((M, pooled, D), np.float32)
    for m in range(M):
        y1, y2 = float(starts[m]), float(ends[m])
        roi_h = max(y2 - y1, 1.0)
        bin_h = roi_h / pooled
        grid_h = max(int(np.ceil(roi_h / pooled)), 1)   # sampling_ratio = -1
        for ph in range(pooled):
            acc = np.zeros(D, np.float32)
            for iy in range(grid_h):
                y = y1 + ph * bin_h + (iy + 0.5) * bin_h / grid_h
                acc += _bilinear_1d(feature, y)
            out[m, ph] = acc / grid_h
    return out


def extract_roi_features_np(features, proposals, roi_size, feat_dim,
                            max_proposal, is_training, seed=0):
    rng = np.random.RandomState(seed)
    num_prop = [int(p.shape[0]) for p in proposals]
    batch = len(proposals)
    max_num = max(num_prop)
    if is_training:
        max_num = min(max_num, max_proposal)
    prop_features = np.zeros((batch, max_num, roi_size, feat_dim), np.float32)
    prop_mask = np.zeros((batch, max_num), np.float32)
    for i in range(batch):
        feature = np.asarray(features[i], np.float32)
        proposal = np.asarray(proposals[i], np.float32)
        if num_prop[i] > max_num:
            idx = rng.permutation(num_prop[i])[:max_num]
            proposal = proposal[idx]
        start, end = proposal[:, 0], proposal[:, 1]
        len_prop = end - start
        start_ext = start - 0.25 * len_prop
        end_ext = end + 0.25 * len_prop
        fill_len = int(np.ceil(0.25 * len_prop.max())) + 1
        fill_blank = np.zeros((fill_len, feat_dim), np.float32)
        feature = np.concatenate([fill_blank, feature, fill_blank], axis=0)
        start_ext = start_ext + fill_len - 0.5
        end_ext = end_ext + fill_len - 0.5
        feat_roi = _roi_align_1d(feature, start_ext, end_ext, roi_size)
        prop_features[i, :proposal.shape[0], :, :] = feat_roi
        prop_mask[i, :proposal.shape[0]] = 1.0
    return prop_features, prop_mask


# ----------------------------------------------------------------------------
# Pallas kernel: fused Backbone_Proposal forward over one (modality, row-tile).
# ----------------------------------------------------------------------------
def _pmil_kernel(r6, feat_ref, wf_ref, bf_ref, w1_ref, b1_ref, w2_ref, b2_ref,
                 out_ref):
    # Feature tile arrives as bf16 (halves HBM traffic); upcast once in registers.
    feat = feat_ref[...].astype(jnp.float32)             # [TN, R, D]

    # Segment max-pools over the RoI bins.
    f1 = jnp.max(feat[:, :r6, :], axis=1)                # [TN, D]
    f2 = jnp.max(feat[:, r6:5 * r6, :], axis=1)          # [TN, D]
    f3 = jnp.max(feat[:, 5 * r6:, :], axis=1)            # [TN, D]

    # cat(f2-f1, f2, f2-f3) @ Wf, folded on the host into:
    #   f1 @ (-Wf0) + f2 @ (Wf0+Wf1+Wf2) + f3 @ (-Wf2)
    x = (jnp.dot(f1, wf_ref[0], preferred_element_type=jnp.float32)
         + jnp.dot(f2, wf_ref[1], preferred_element_type=jnp.float32)
         + jnp.dot(f3, wf_ref[2], preferred_element_type=jnp.float32))
    fuse = jnp.maximum(x + bf_ref[...], 0.0)             # Linear+ReLU (Dropout=id, eval)

    # Three heads fused: one [D, 3E] matmul + ReLU, then one block-diagonal
    # [3E, C+3] matmul producing packed (cas | attn | iou).
    h = jnp.maximum(
        jnp.dot(fuse, w1_ref[...], preferred_element_type=jnp.float32)
        + b1_ref[...], 0.0)                              # [TN, 3E]
    out_ref[...] = (jnp.dot(h, w2_ref[...], preferred_element_type=jnp.float32)
                    + b2_ref[...]).astype(out_ref.dtype)  # [TN, C+3]


def _round_up(x, m):
    return ((x + m - 1) // m) * m


def pmil_backbone_forward(prop_features, packed, roi_size, n_class, row_tile=512):
    """prop_features: [B, M, R, feat_dim] f32.  Runs BOTH modalities in one call.

    Returns ((v_cas, v_attn, v_iou), (f_cas, f_attn, f_iou)) with shapes
    [B, M, C+1] / [B, M, 1] / [B, M, 1] (the transposed layout P_MIL.forward emits).
    """
    assert roi_size >= 6, "roi_size must be >= 6 (PyTorch segment split)"
    assert row_tile % 8 == 0
    B, M, R, Dfull = prop_features.shape
    D = Dfull // 2
    C1 = n_class + 1
    Cout = C1 + 2
    N = B * M

    # Stack modalities on a leading axis; bf16 feature slab (f32 accumulation).
    x = jnp.stack([prop_features[..., :D], prop_features[..., D:]], axis=0)
    x = x.reshape(2, N, R, D).astype(jnp.bfloat16)

    tn = min(row_tile, _round_up(N, 8))     # big tiles; clamp for tiny inputs
    Npad = _round_up(N, tn)
    if Npad != N:
        x = jnp.pad(x, ((0, 0), (0, Npad - N), (0, 0), (0, 0)))

    r6 = roi_size // 6
    kernel = functools.partial(_pmil_kernel, r6)
    grid = (2, Npad // tn)                  # (modality, row tiles) -- both parallel
    E3 = packed['w1'].shape[-1]

    in_specs = [
        pl.BlockSpec((None, tn, R, D), lambda m, i: (m, i, 0, 0)),    # feature tile
        pl.BlockSpec((None, 3, D, D), lambda m, i: (m, 0, 0, 0)),     # folded Wf
        pl.BlockSpec((None, 1, D), lambda m, i: (m, 0, 0)),           # bf
        pl.BlockSpec((None, D, E3), lambda m, i: (m, 0, 0)),          # fused head L1
        pl.BlockSpec((None, 1, E3), lambda m, i: (m, 0, 0)),          # fused bias L1
        pl.BlockSpec((None, E3, Cout), lambda m, i: (m, 0, 0)),       # block-diag L2
        pl.BlockSpec((None, 1, Cout), lambda m, i: (m, 0, 0)),        # fused bias L2
    ]
    out_specs = pl.BlockSpec((None, tn, Cout), lambda m, i: (m, i, 0))
    out_shape = jax.ShapeDtypeStruct((2, Npad, Cout), jnp.float32)

    out = pl.pallas_call(
        kernel,
        out_shape=out_shape,
        grid=grid,
        in_specs=in_specs,
        out_specs=out_specs,
        compiler_params=pltpu.CompilerParams(
            dimension_semantics=("parallel", "parallel")),
    )(x, packed['wf'], packed['bf'], packed['w1'], packed['b1'],
      packed['w2'], packed['b2'])

    out = out[:, :N].reshape(2, B, M, Cout)
    cas, attn, iou = out[..., :C1], out[..., C1:C1 + 1], out[..., C1 + 1:]
    return (cas[0], attn[0], iou[0]), (cas[1], attn[1], iou[1])


# ----------------------------------------------------------------------------
# Parameters (shapes follow Backbone_Proposal.__init__), folded for the kernel.
# Weights are stored pre-transposed for row-major [N, Cin] @ [Cin, Cout].
# ----------------------------------------------------------------------------
def init_backbone_params(key, feat_dim, n_class):
    embed = feat_dim // 2
    ks = jax.random.split(key, 14)
    w = lambda k, shape: 0.05 * jax.random.normal(k, shape, jnp.float32)
    return dict(
        wf=w(ks[0], (3 * feat_dim, feat_dim)), bf=w(ks[1], (feat_dim,)),
        wc1=w(ks[2], (feat_dim, embed)), bc1=w(ks[3], (embed,)),
        wc2=w(ks[4], (embed, n_class + 1)), bc2=w(ks[5], (n_class + 1,)),
        wa1=w(ks[6], (feat_dim, embed)), ba1=w(ks[7], (embed,)),
        wa2=w(ks[8], (embed, 1)), ba2=w(ks[9], (1,)),
        wi1=w(ks[10], (feat_dim, embed)), bi1=w(ks[11], (embed,)),
        wi2=w(ks[12], (embed, 1)), bi2=w(ks[13], (1,)),
    )


def pack_backbone_params(p, n_class):
    """Fold/fuse the Backbone_Proposal weights for the fused Pallas kernel."""
    D, E = p['wc1'].shape
    C1 = n_class + 1
    wf0, wf1, wf2 = p['wf'][:D], p['wf'][D:2 * D], p['wf'][2 * D:]
    # cat(f2-f1, f2, f2-f3) @ Wf  ==  f1 @ (-Wf0) + f2 @ (Wf0+Wf1+Wf2) + f3 @ (-Wf2)
    wf_eff = jnp.stack([-wf0, wf0 + wf1 + wf2, -wf2], axis=0)        # [3, D, D]
    w1 = jnp.concatenate([p['wc1'], p['wa1'], p['wi1']], axis=1)     # [D, 3E]
    b1 = jnp.concatenate([p['bc1'], p['ba1'], p['bi1']])[None, :]    # [1, 3E]
    w2 = jnp.zeros((3 * E, C1 + 2), jnp.float32)                     # block-diagonal
    w2 = w2.at[:E, :C1].set(p['wc2'])
    w2 = w2.at[E:2 * E, C1:C1 + 1].set(p['wa2'])
    w2 = w2.at[2 * E:, C1 + 1:].set(p['wi2'])
    b2 = jnp.concatenate([p['bc2'], p['ba2'], p['bi2']])[None, :]    # [1, C1+2]
    return dict(wf=wf_eff, bf=p['bf'][None, :], w1=w1, b1=b1, w2=w2, b2=b2)


class PMILPallas:
    def __init__(self, feature_size, num_class, roi_size, max_proposal, key,
                 row_tile=512):
        self.feat_dim = feature_size
        self.num_class = num_class
        self.roi_size = roi_size
        self.max_proposal = max_proposal
        self.row_tile = row_tile
        half = feature_size // 2
        kv, kf = jax.random.split(key)
        pv = pack_backbone_params(init_backbone_params(kv, half, num_class),
                                  num_class)
        pf = pack_backbone_params(init_backbone_params(kf, half, num_class),
                                  num_class)
        # Stack the two modalities on a leading axis -> selected by the modality
        # grid axis inside the single pallas_call.
        self.packed = {k: jnp.stack([pv[k], pf[k]], axis=0) for k in pv}

    def forward(self, features, proposals, is_training=True):
        prop_features, prop_mask = extract_roi_features_np(
            features, proposals, self.roi_size, self.feat_dim,
            self.max_proposal, is_training)
        prop_features = jnp.asarray(prop_features)          # [B, M, R, feat_dim]
        (v_cas, v_attn, v_iou), (f_cas, f_attn, f_iou) = pmil_backbone_forward(
            prop_features, self.packed, self.roi_size, self.num_class,
            row_tile=self.row_tile)
        # Backbone emits [B, C, M]; P_MIL.forward transposes back — we return the
        # final transposed layout [B, M, C] / [B, M, 1] directly.
        return {
            'prop_v_cas': v_cas, 'prop_f_cas': f_cas,
            'prop_v_attn': v_attn, 'prop_f_attn': f_attn,
            'prop_v_iou': v_iou, 'prop_f_iou': f_iou,
            'prop_mask': jnp.asarray(prop_mask),
        }


if __name__ == "__main__":
    key = jax.random.PRNGKey(0)
    k_model, k_f0, k_f1 = jax.random.split(key, 3)

    feature_size = 64      # args.feature_size  (per-modality D = 32, embed = 16)
    num_class = 4          # args.num_class     (C+1 = 5)
    roi_size = 12          # args.roi_size
    max_proposal = 16      # args.max_proposal
    T = 20                 # frames per video

    model = PMILPallas(feature_size, num_class, roi_size, max_proposal, k_model)

    # features: list of [T, D] arrays; proposals: list of [M, 2] (start, end) frames
    features = [
        np.asarray(jax.random.normal(k_f0, (T, feature_size), jnp.float32)),
        np.asarray(jax.random.normal(k_f1, (T, feature_size), jnp.float32)),
    ]
    proposals = [
        np.array([[1.0, 6.0], [3.0, 11.0], [0.0, 4.0],
                  [8.0, 15.0], [5.0, 18.0], [12.0, 19.0]], np.float32),
        np.array([[2.0, 9.0], [0.0, 5.0], [7.0, 16.0], [10.0, 19.0]], np.float32),
    ]

    outputs = model.forward(features, proposals, is_training=True)
    jax.block_until_ready(outputs)

    B, M = outputs['prop_mask'].shape
    assert outputs['prop_v_cas'].shape == (B, M, num_class + 1)
    assert outputs['prop_f_cas'].shape == (B, M, num_class + 1)
    assert outputs['prop_v_attn'].shape == (B, M, 1)
    assert outputs['prop_v_iou'].shape == (B, M, 1)
    assert bool(jnp.all(jnp.isfinite(outputs['prop_v_cas'])))
    assert bool(jnp.all(jnp.isfinite(outputs['prop_f_cas'])))
    assert bool(jnp.all(jnp.isfinite(outputs['prop_v_attn'])))
    assert bool(jnp.all(jnp.isfinite(outputs['prop_v_iou'])))
    print("KERNEL_OK")
</pallas_src>

<mosaic_0001>
module attributes {stable_mosaic.version = 11 : i64} {
  func.func @_pmil_kernel(%arg0: i32, %arg1: i32, %arg2: memref<1x16x12x32xbf16, #tpu.memory_space<vmem>>, %arg3: memref<1x3x32x32xf32, #tpu.memory_space<vmem>>, %arg4: memref<1x1x32xf32, #tpu.memory_space<vmem>>, %arg5: memref<1x32x48xf32, #tpu.memory_space<vmem>>, %arg6: memref<1x1x48xf32, #tpu.memory_space<vmem>>, %arg7: memref<1x48x7xf32, #tpu.memory_space<vmem>>, %arg8: memref<1x1x7xf32, #tpu.memory_space<vmem>>, %arg9: memref<1x16x7xf32, #tpu.memory_space<vmem>>) attributes {dimension_semantics = [#tpu.dimension_semantics<parallel>, #tpu.dimension_semantics<parallel>], iteration_bounds = array<i64: 2, 1>, scalar_prefetch = 0 : i64, scratch_operands = 0 : i64, tpu.core_type = #tpu.core_type<tc>, window_params = [{transform_indices = @transform_0, window_bounds = array<i64: 1, 16, 12, 32>}, {transform_indices = @transform_1, window_bounds = array<i64: 1, 3, 32, 32>}, {transform_indices = @transform_2, window_bounds = array<i64: 1, 1, 32>}, {transform_indices = @transform_3, window_bounds = array<i64: 1, 32, 48>}, {transform_indices = @transform_4, window_bounds = array<i64: 1, 1, 48>}, {transform_indices = @transform_5, window_bounds = array<i64: 1, 48, 7>}, {transform_indices = @transform_6, window_bounds = array<i64: 1, 1, 7>}, {transform_indices = @transform_7, window_bounds = array<i64: 1, 16, 7>}]} {
    %c0 = arith.constant 0 : index
    %c0_0 = arith.constant 0 : index
    %c0_1 = arith.constant 0 : index
    %c0_2 = arith.constant 0 : index
    %0 = vector.load %arg2[%c0, %c0_0, %c0_1, %c0_2] : memref<1x16x12x32xbf16, #tpu.memory_space<vmem>>, vector<1x16x12x32xbf16>
    %1 = vector.shape_cast %0 : vector<1x16x12x32xbf16> to vector<16x12x32xbf16>
    %2 = arith.extf %1 : vector<16x12x32xbf16> to vector<16x12x32xf32>
    %3 = vector.extract_strided_slice %2 {offsets = [0, 0, 0], sizes = [16, 2, 32], strides = [1, 1, 1]} : vector<16x12x32xf32> to vector<16x2x32xf32>
    %cst = arith.constant dense<0xFF800000> : vector<16x32xf32>
    %4 = vector.multi_reduction <maximumf>, %3, %cst [1] : vector<16x2x32xf32> to vector<16x32xf32>
    %5 = vector.extract_strided_slice %2 {offsets = [0, 2, 0], sizes = [16, 8, 32], strides = [1, 1, 1]} : vector<16x12x32xf32> to vector<16x8x32xf32>
    %cst_3 = arith.constant dense<0xFF800000> : vector<16x32xf32>
    %6 = vector.multi_reduction <maximumf>, %5, %cst_3 [1] : vector<16x8x32xf32> to vector<16x32xf32>
    %7 = vector.extract_strided_slice %2 {offsets = [0, 10, 0], sizes = [16, 2, 32], strides = [1, 1, 1]} : vector<16x12x32xf32> to vector<16x2x32xf32>
    %cst_4 = arith.constant dense<0xFF800000> : vector<16x32xf32>
    %8 = vector.multi_reduction <maximumf>, %7, %cst_4 [1] : vector<16x2x32xf32> to vector<16x32xf32>
    %c0_5 = arith.constant 0 : index
    %c0_6 = arith.constant 0 : index
    %c0_7 = arith.constant 0 : index
    %c0_8 = arith.constant 0 : index
    %9 = vector.load %arg3[%c0_5, %c0_6, %c0_7, %c0_8] : memref<1x3x32x32xf32, #tpu.memory_space<vmem>>, vector<1x1x32x32xf32>
    %10 = vector.shape_cast %9 : vector<1x1x32x32xf32> to vector<32x32xf32>
    %cst_9 = arith.constant dense<0.000000e+00> : vector<16x32xf32>
    %11 = tpu.matmul %4, %10, %cst_9 {dimension_numbers = #tpu.dot_dimension_numbers<[1], [0], [0], [1], [0, 0, 1, 1], [], []>} : vector<16x32xf32>, vector<32x32xf32>, vector<16x32xf32> -> vector<16x32xf32>
    %c0_10 = arith.constant 0 : index
    %c1 = arith.constant 1 : index
    %c0_11 = arith.constant 0 : index
    %c0_12 = arith.constant 0 : index
    %12 = vector.load %arg3[%c0_10, %c1, %c0_11, %c0_12] : memref<1x3x32x32xf32, #tpu.memory_space<vmem>>, vector<1x1x32x32xf32>
    %13 = vector.shape_cast %12 : vector<1x1x32x32xf32> to vector<32x32xf32>
    %cst_13 = arith.constant dense<0.000000e+00> : vector<16x32xf32>
    %14 = tpu.matmul %6, %13, %cst_13 {dimension_numbers = #tpu.dot_dimension_numbers<[1], [0], [0], [1], [0, 0, 1, 1], [], []>} : vector<16x32xf32>, vector<32x32xf32>, vector<16x32xf32> -> vector<16x32xf32>
    %15 = arith.addf %11, %14 : vector<16x32xf32>
    %c0_14 = arith.constant 0 : index
    %c2 = arith.constant 2 : index
    %c0_15 = arith.constant 0 : index
    %c0_16 = arith.constant 0 : index
    %16 = vector.load %arg3[%c0_14, %c2, %c0_15, %c0_16] : memref<1x3x32x32xf32, #tpu.memory_space<vmem>>, vector<1x1x32x32xf32>
    %17 = vector.shape_cast %16 : vector<1x1x32x32xf32> to vector<32x32xf32>
    %cst_17 = arith.constant dense<0.000000e+00> : vector<16x32xf32>
    %18 = tpu.matmul %8, %17, %cst_17 {dimension_numbers = #tpu.dot_dimension_numbers<[1], [0], [0], [1], [0, 0, 1, 1], [], []>} : vector<16x32xf32>, vector<32x32xf32>, vector<16x32xf32> -> vector<16x32xf32>
    %19 = arith.addf %15, %18 : vector<16x32xf32>
    %c0_18 = arith.constant 0 : index
    %c0_19 = arith.constant 0 : index
    %c0_20 = arith.constant 0 : index
    %20 = vector.load %arg4[%c0_18, %c0_19, %c0_20] : memref<1x1x32xf32, #tpu.memory_space<vmem>>, vector<1x1x32xf32>
    %21 = vector.shape_cast %20 : vector<1x1x32xf32> to vector<1x32xf32>
    %22 = vector.broadcast %21 : vector<1x32xf32> to vector<16x32xf32>
    %23 = arith.addf %19, %22 : vector<16x32xf32>
    %cst_21 = arith.constant 0.000000e+00 : f32
    %24 = vector.broadcast %cst_21 : f32 to vector<16x32xf32>
    %25 = arith.maximumf %23, %24 : vector<16x32xf32>
    %c0_22 = arith.constant 0 : index
    %c0_23 = arith.constant 0 : index
    %c0_24 = arith.constant 0 : index
    %26 = vector.load %arg5[%c0_22, %c0_23, %c0_24] : memref<1x32x48xf32, #tpu.memory_space<vmem>>, vector<1x32x48xf32>
    %27 = vector.shape_cast %26 : vector<1x32x48xf32> to vector<32x48xf32>
    %cst_25 = arith.constant dense<0.000000e+00> : vector<16x48xf32>
    %28 = tpu.matmul %25, %27, %cst_25 {dimension_numbers = #tpu.dot_dimension_numbers<[1], [0], [0], [1], [0, 0, 1, 1], [], []>} : vector<16x32xf32>, vector<32x48xf32>, vector<16x48xf32> -> vector<16x48xf32>
    %c0_26 = arith.constant 0 : index
    %c0_27 = arith.constant 0 : index
    %c0_28 = arith.constant 0 : index
    %29 = vector.load %arg6[%c0_26, %c0_27, %c0_28] : memref<1x1x48xf32, #tpu.memory_space<vmem>>, vector<1x1x48xf32>
    %30 = vector.shape_cast %29 : vector<1x1x48xf32> to vector<1x48xf32>
    %31 = vector.broadcast %30 : vector<1x48xf32> to vector<16x48xf32>
    %32 = arith.addf %28, %31 : vector<16x48xf32>
    %cst_29 = arith.constant 0.000000e+00 : f32
    %33 = vector.broadcast %cst_29 : f32 to vector<16x48xf32>
    %34 = arith.maximumf %32, %33 : vector<16x48xf32>
    %c0_30 = arith.constant 0 : index
    %c0_31 = arith.constant 0 : index
    %c0_32 = arith.constant 0 : index
    %35 = vector.load %arg7[%c0_30, %c0_31, %c0_32] : memref<1x48x7xf32, #tpu.memory_space<vmem>>, vector<1x48x7xf32>
    %36 = vector.shape_cast %35 : vector<1x48x7xf32> to vector<48x7xf32>
    %cst_33 = arith.constant dense<0.000000e+00> : vector<16x7xf32>
    %37 = tpu.matmul %34, %36, %cst_33 {dimension_numbers = #tpu.dot_dimension_numbers<[1], [0], [0], [1], [0, 0, 1, 1], [], []>} : vector<16x48xf32>, vector<48x7xf32>, vector<16x7xf32> -> vector<16x7xf32>
    %c0_34 = arith.constant 0 : index
    %c0_35 = arith.constant 0 : index
    %c0_36 = arith.constant 0 : index
    %38 = vector.load %arg8[%c0_34, %c0_35, %c0_36] : memref<1x1x7xf32, #tpu.memory_space<vmem>>, vector<1x1x7xf32>
    %39 = vector.shape_cast %38 : vector<1x1x7xf32> to vector<1x7xf32>
    %40 = vector.broadcast %39 : vector<1x7xf32> to vector<16x7xf32>
    %41 = arith.addf %37, %40 : vector<16x7xf32>
    %c0_37 = arith.constant 0 : index
    %c0_38 = arith.constant 0 : index
    %c0_39 = arith.constant 0 : index
    %42 = vector.load %arg9[%c0_37, %c0_38, %c0_39] : memref<1x16x7xf32, #tpu.memory_space<vmem>>, vector<1x16x7xf32>
    %43 = vector.shape_cast %42 : vector<1x16x7xf32> to vector<16x7xf32>
    %44 = vector.shape_cast %41 : vector<16x7xf32> to vector<1x16x7xf32>
    tpu.vector_store %arg9[%c0_37, %c0_38, %c0_39], %44 {strides = array<i32>} : memref<1x16x7xf32, #tpu.memory_space<vmem>>, vector<1x16x7xf32>,
    return
  }
  func.func @transform_0(%arg0: i32, %arg1: i32) -> (i32, i32, i32, i32) {
    %c0_i32 = arith.constant 0 : i32
    %c0_i32_0 = arith.constant 0 : i32
    %c0_i32_1 = arith.constant 0 : i32
    return %arg0, %arg1, %c0_i32, %c0_i32_0 : i32, i32, i32, i32
  }
  func.func @transform_1(%arg0: i32, %arg1: i32) -> (i32, i32, i32, i32) {
    %c0_i32 = arith.constant 0 : i32
    %c0_i32_0 = arith.constant 0 : i32
    %c0_i32_1 = arith.constant 0 : i32
    %c0_i32_2 = arith.constant 0 : i32
    return %arg0, %c0_i32, %c0_i32_0, %c0_i32_1 : i32, i32, i32, i32
  }
  func.func @transform_2(%arg0: i32, %arg1: i32) -> (i32, i32, i32) {
    %c0_i32 = arith.constant 0 : i32
    %c0_i32_0 = arith.constant 0 : i32
    %c0_i32_1 = arith.constant 0 : i32
    return %arg0, %c0_i32, %c0_i32_0 : i32, i32, i32
  }
  func.func @transform_3(%arg0: i32, %arg1: i32) -> (i32, i32, i32) {
    %c0_i32 = arith.constant 0 : i32
    %c0_i32_0 = arith.constant 0 : i32
    %c0_i32_1 = arith.constant 0 : i32
    return %arg0, %c0_i32, %c0_i32_0 : i32, i32, i32
  }
  func.func @transform_4(%arg0: i32, %arg1: i32) -> (i32, i32, i32) {
    %c0_i32 = arith.constant 0 : i32
    %c0_i32_0 = arith.constant 0 : i32
    %c0_i32_1 = arith.constant 0 : i32
    return %arg0, %c0_i32, %c0_i32_0 : i32, i32, i32
  }
  func.func @transform_5(%arg0: i32, %arg1: i32) -> (i32, i32, i32) {
    %c0_i32 = arith.constant 0 : i32
    %c0_i32_0 = arith.constant 0 : i32
    %c0_i32_1 = arith.constant 0 : i32
    return %arg0, %c0_i32, %c0_i32_0 : i32, i32, i32
  }
  func.func @transform_6(%arg0: i32, %arg1: i32) -> (i32, i32, i32) {
    %c0_i32 = arith.constant 0 : i32
    %c0_i32_0 = arith.constant 0 : i32
    %c0_i32_1 = arith.constant 0 : i32
    return %arg0, %c0_i32, %c0_i32_0 : i32, i32, i32
  }
  func.func @transform_7(%arg0: i32, %arg1: i32) -> (i32, i32, i32) {
    %c0_i32 = arith.constant 0 : i32
    %c0_i32_0 = arith.constant 0 : i32
    return %arg0, %arg1, %c0_i32 : i32, i32, i32
  }
}

</mosaic_0001>

<bundles_post_ra>
// kernel: tpu_custom_call.1
= control target key start
LH: loop header
LB: loop body
LE: loop exit
PB: predicated region body
PF: predicated region fallthrough
CT: control target
= control target key end

     0   :  { %s1431_s24 = smov 0   ;;  %s1433_s25 = smov 0   ;;  %s1888_s0 = inlined_call_operand.vmem [shape: bf16[2,16,12,32], index: 0, kind: input, shape index: {}]   ;;  %s1889_s1 = inlined_call_operand.vmem [shape: f32[2,3,32,32], index: 1, kind: input, shape index: {}]   ;;  %s1890_s2 = inlined_call_operand.vmem [shape: f32[2,1,32], index: 2, kind: input, shape index: {}]   ;;  %s1891_s3 = inlined_call_operand.vmem [shape: f32[2,32,48], index: 3, kind: input, shape index: {}]   ;;  %s1892_s4 = inlined_call_operand.vmem [shape: f32[2,1,48], index: 4, kind: input, shape index: {}]   ;;  %s1893_s5 = inlined_call_operand.vmem [shape: f32[2,48,7], index: 5, kind: input, shape index: {}]   ;;  %s1894_s6 = inlined_call_operand.vmem [shape: f32[2,1,7], index: 6, kind: input, shape index: {}]   ;;  %s1895_s7 = inlined_call_operand.vmem [shape: f32[2,16,7], index: 7, kind: output, shape index: {}]  }
   0x1   :  { %s1435_s26 = smov 0  }
   0x2 LB: > { %s29_s27 = sadd.s32 1, %s1385_s25  ;;  %p1300_p0 = scmp.ge.s32.totalorder %s1389_s26, 1  ;;  %s1389_s26 = sphi %s1435_s26, %s17_s26   ;;  %s1385_s25 = sphi %s1433_s25, %s1897_s25   ;;  %s1381_s24 = sphi %s1431_s24, %s1896_s24  }
   0x3   : > { %p31_p1 = scmp.ge.s32.totalorder %s29_s27, 2  ;;  %p313_p2 = scmp.lt.s32.totalorder %s1389_s26, 3 }
   0x5   : > { %s1899_s27 = smov (%p31_p1, %s29_s27), 0  ;;  %p314_p3 = pnand %p1300_p0, %p313_p2 }
   0x6   : > { %p379_p4 = scmp.lt.s32.totalorder (!%p314_p3), %s1381_s24, 1 }
   0x7   : > { %317 = sbr.rel (%p314_p3) target bundleno = 535 (0x217), region = 48 }
   0xc   : > { %s1901_s24 = smov (!%p379_p4, %s1381_s24), 1  ;;  %vm745_vm0 = vcmask 257026   ;;  %vm883_vm1 = vcmask 1041409   ;;  %vm885_vm2 = vcmask 1042434   ;;  %vm887_vm3 = vcmask 1043459  }
   0xd   : > { %s1329_s28 = sshll.u32 %s1901_s24, 7  ;;  %s1338_s29 = smul.u32 96, %s1901_s24  ;;  %vm889_vm4 = vcmask 1044484   ;;  %vm891_vm5 = vcmask 1045509   ;;  %vm600_vm6 = vcmask 261122   ;;  %vm893_vm7 = vcmask 1046534  }
   0xe   : > { %s1456_s9 = scalar_lea.vmem %s1888_s0, %s1329_s28  ;;  %vm487_vm8 = vcmask 254976   ;;  %vm895_vm9 = vcmask 1047559   ;;  %vm904_vm10 = vcmask 261120   ;;  %s396_s15 = scalar_lea.vmem %s1890_s2, %s1901_s24  ;;  %vm1110_vm11 = vcmask 392192  }
   0xf   : > { %s1461_s12 = scalar_lea.vmem %s1889_s1, %s1338_s29  ;;  %v1464_v0 = vld [vmem:[%s1456_s9 + $0x4] sm:$0x3]  ;;  %v1467_v1 = vld [vmem:[%s1456_s9 + $0xc] sm:$0x3]  ;;  %v1470_v2 = vld [vmem:[%s1456_s9 + $0x14] sm:$0x3]  ;;  %s404_s18 = scalar_lea.vmem %s1892_s4, %s1901_s24 }
  0x10   : > { %v1320_v3 = vld [vmem:[%s1461_s12 + $0x58] sm:$0xff]  ;;  %v1319_v4 = vld [vmem:[%s1461_s12 + $0x50] sm:$0xff]  ;;  %v456_v6 = vunpack.c.l.bf16 %v1464_v0  ;;  %v458_v7 = vunpack.c.l.bf16 %v1467_v1  ;;  %v1318_v9 = vld [vmem:[%s1461_s12 + $0x48] sm:$0xff]  ;;  %v460_v11 = vunpack.c.l.bf16 %v1470_v2  ;;  %s1330_s19 = sshll.u32 %s1901_s24, 5  ;;  %s1339_s29 = smul.u32 48, %s1901_s24  ;;  %vm1140_vm12 = vcmask 56320  }
  0x11   : > { %v1312_v5 = vld [vmem:[%s1461_s12 + $0x38] sm:$0xff]  ;;  %1040 = vmatpush.msra.mxu2 %v1320_v3  ;;  %v1311_v10 = vld [vmem:[%s1461_s12 + $0x30] sm:$0xff]  ;;  %v1317_v13 = vld [vmem:[%s1461_s12 + $0x40] sm:$0xff]  ;;  %s401_s22 = scalar_lea.vmem %s1891_s3, %s1330_s19 }
  0x12   : > { %921 = vmatpush.msra.mxu0 %v1312_v5  ;;  %v861_v8 = vld [vmem:[%s1461_s12 + $0x18] sm:$0xff]  ;;  %v860_v12 = vld [vmem:[%s1461_s12 + $0x10] sm:$0xff]  ;;  %v746_v15 = vsel %vm745_vm0, %v456_v6, -inf  ;;  %v753_v16 = vsel %vm745_vm0, %v458_v7, -inf  ;;  %v1493_v17 = vld [vmem:[%s1456_s9 + $0x24] sm:$0x3] }
  0x13   : > { %978 = vmatpush.msra.mxu1 %v861_v8  ;;  %v1484_v14 = vld [vmem:[%s1456_s9 + $0x1c] sm:$0x3]  ;;  %1041 = vmatpush.msra.mxu2 %v1319_v4  ;;  %v1496_v18 = vld [vmem:[%s1456_s9 + $0x2c] sm:$0x3]  ;;  %v1499_v19 = vld [vmem:[%s1456_s9 + $0x34] sm:$0x3]  ;;  %v464_v22 = vunpack.c.l.bf16 %v1493_v17 }
  0x14   : > { %922 = vmatpush.msra.mxu0 %v1311_v10  ;;  %v462_v20 = vunpack.c.l.bf16 %v1484_v14  ;;  %v1503_v21 = vld [vmem:[%s1456_s9 + $0x3c] sm:$0x3]  ;;  %v466_v23 = vunpack.c.l.bf16 %v1496_v18  ;;  %v468_v24 = vunpack.c.l.bf16 %v1499_v19  ;;  %v747_v25 = vrot.slane %v746_v15, 4  ;;  %v1310_v26 = vld [vmem:[%s1461_s12 + $0x28] sm:$0xff]  ;;  %v1309_v32 = vld [vmem:[%s1461_s12 + $0x20] sm:$0xff] }
  0x15   : > { %979 = vmatpush.msra.mxu1 %v860_v12  ;;  %v859_v27 = vld [vmem:[%s1461_s12 + $0x8] sm:$0xff]  ;;  %1042 = vmatpush.msra.mxu2 %v1318_v9  ;;  %v470_v28 = vunpack.c.l.bf16 %v1503_v21  ;;  %v754_v29 = vrot.slane %v753_v16, 4  ;;  %v760_v30 = vsel %vm745_vm0, %v460_v11, -inf  ;;  %v858_v33 = vld [vmem:[%s1461_s12] sm:$0xff]  ;;  %v774_v37 = vsel %vm745_vm0, %v464_v22, -inf  ;;  %s412_s12 = scalar_lea.vmem %s1894_s6, %s1901_s24 }
  0x16   : > { %v767_v31 = vsel %vm745_vm0, %v462_v20, -inf  ;;  %923 = vmatpush.msra.mxu0 %v1310_v26  ;;  %v748_v34 = vmax.f32 %v746_v15, %v747_v25  ;;  %v761_v35 = vrot.slane %v760_v30, 4  ;;  %v775_v39 = vrot.slane %v774_v37, 4  ;;  %v1532_v5 = vld [vmem:[%s1456_s9] sm:$0xf] }
  0x17   : > { %v768_v36 = vrot.slane %v767_v31, 4  ;;  %980 = vmatpush.msra.mxu1 %v859_v27  ;;  %1043 = vmatpush.msra.mxu2 %v1317_v13  ;;  %v755_v38 = vmax.f32 %v753_v16, %v754_v29  ;;  %v781_v40 = vsel %vm745_vm0, %v466_v23, -inf  ;;  %v788_v41 = vsel %vm745_vm0, %v468_v24, -inf  ;;  %v1535_v26 = vld [vmem:[%s1456_s9 + $0x8] sm:$0xf] }
  0x18   : > { %924 = vmatpush.msra.mxu0 %v1309_v32  ;;  %v749_v42 = vrot.slane %v748_v34, 2  ;;  %v762_v43 = vmax.f32 %v760_v30, %v761_v35  ;;  %v782_v45 = vrot.slane %v781_v40, 4  ;;  %v776_v47 = vmax.f32 %v774_v37, %v775_v39  ;;  %v1538_v27 = vld [vmem:[%s1456_s9 + $0x10] sm:$0xf]  ;;  %v1541_v32 = vld [vmem:[%s1456_s9 + $0x18] sm:$0xf] }
  0x19   : > { %v769_v44 = vmax.f32 %v767_v31, %v768_v36  ;;  %981 = vmatpush.msra.mxu1 %v858_v33  ;;  %v756_v46 = vrot.slane %v755_v38, 2  ;;  %v789_v48 = vrot.slane %v788_v41, 4  ;;  %v795_v49 = vsel %vm745_vm0, %v470_v28, -inf  ;;  %v1544_v33 = vld [vmem:[%s1456_s9 + $0x20] sm:$0xf] }
  0x1a   : > { %v750_v50 = vmax.f32 %v748_v34, %v749_v42  ;;  %v763_v51 = vrot.slane %v762_v43, 2  ;;  %v783_v53 = vmax.f32 %v781_v40, %v782_v45  ;;  %v777_v55 = vrot.slane %v776_v47, 2  ;;  %v1549_v39 = vld [vmem:[%s1456_s9 + $0x28] sm:$0xf]  ;;  %v1552_v40 = vld [vmem:[%s1456_s9 + $0x30] sm:$0xf] }
  0x1b   : > { %v770_v52 = vrot.slane %v769_v44, 2  ;;  %v757_v54 = vmax.f32 %v755_v38, %v756_v46  ;;  %v790_v56 = vmax.f32 %v788_v41, %v789_v48  ;;  %v796_v57 = vrot.slane %v795_v49, 4 }
  0x1c   : > { %v751_v58 = vrot.slane %v750_v50, 1  ;;  %v764_v59 = vmax.f32 %v762_v43, %v763_v51  ;;  %v784_v61 = vrot.slane %v783_v53, 2  ;;  %v778_v63 = vmax.f32 %v776_v47, %v777_v55  ;;  %v1556_v43 = vld [vmem:[%s1456_s9 + $0x38] sm:$0xf] }
  0x1d   : > { %v771_v60 = vmax.f32 %v769_v44, %v770_v52  ;;  %v758_v62 = vrot.slane %v757_v54, 1  ;;  %v791_v3 = vrot.slane %v790_v56, 2  ;;  %v797_v4 = vmax.f32 %v795_v49, %v796_v57 }
  0x1e   : > { %v752_v8 = vmax.f32 %v750_v50, %v751_v58  ;;  %v765_v9 = vrot.slane %v764_v59, 1  ;;  %v785_v12 = vmax.f32 %v783_v53, %v784_v61  ;;  %v779_v15 = vrot.slane %v778_v63, 1 }
  0x1f   : > { %v772_v10 = vrot.slane %v771_v60, 1  ;;  %v759_v13 = vmax.f32 %v757_v54, %v758_v62  ;;  %v792_v16 = vmax.f32 %v790_v56, %v791_v3  ;;  %v798_v25 = vrot.slane %v797_v4, 2 }
  0x20   : > { %v766_v29 = vmax.f32 %v764_v59, %v765_v9  ;;  %v786_v31 = vrot.slane %v785_v12, 1  ;;  %v455_v34 = vunpack.c.l.bf16 %v1532_v5  ;;  %v780_v35 = vmax.f32 %v778_v63, %v779_v15 }
  0x21   : > { %v773_v30 = vmax.f32 %v771_v60, %v772_v10  ;;  %v793_v36 = vrot.slane %v792_v16, 1  ;;  %v799_v37 = vmax.f32 %v797_v4, %v798_v25  ;;  %v1010_v38 = vsel %vm883_vm1, %v759_v13, %v752_v8 }
  0x22   : > { %v787_v41 = vmax.f32 %v785_v12, %v786_v31  ;;  %v1011_v42 = vsel %vm885_vm2, %v766_v29, %v1010_v38  ;;  %v457_v44 = vunpack.c.l.bf16 %v1535_v26  ;;  %v459_v45 = vunpack.c.l.bf16 %v1538_v27 }
  0x23   : > { %v794_v46 = vmax.f32 %v792_v16, %v793_v36  ;;  %v800_v47 = vrot.slane %v799_v37, 1  ;;  %v1012_v48 = vsel %vm887_vm3, %v773_v30, %v1011_v42  ;;  %v461_v49 = vunpack.c.l.bf16 %v1541_v32 }
  0x24   : > { %v1013_v50 = vsel %vm889_vm4, %v780_v35, %v1012_v48  ;;  %v463_v51 = vunpack.c.l.bf16 %v1544_v33  ;;  %v465_v52 = vunpack.c.l.bf16 %v1549_v39  ;;  %v467_v53 = vunpack.c.l.bf16 %v1552_v40 }
  0x25   : > { %v801_v54 = vmax.f32 %v799_v37, %v800_v47  ;;  %v1014_v55 = vsel %vm891_vm5, %v787_v41, %v1013_v50  ;;  %v469_v56 = vunpack.c.l.bf16 %v1556_v43  ;;  %v601_v57 = vsel %vm600_vm6, %v455_v34, -inf }
  0x26   : > { %v1015_v58 = vsel %vm893_vm7, %v794_v46, %v1014_v55  ;;  %v602_v59 = vsel %vm487_vm8, %v456_v6, -inf  ;;  %v610_v60 = vsel %vm600_vm6, %v457_v44, -inf  ;;  %v611_v61 = vsel %vm487_vm8, %v458_v7, -inf }
  0x27   : > { %v1016_v62 = vsel %vm895_vm9, %v801_v54, %v1015_v58  ;;  %v603_v63 = vmax.f32 %v601_v57, %v602_v59  ;;  %v612_v3 = vmax.f32 %v610_v60, %v611_v61  ;;  %v619_v4 = vsel %vm600_vm6, %v459_v45, -inf }
  0x28   : > { %1321 = vmatmul.msk.f32.vlgmr.msra.gmra.mxu2 %vm904_vm10, %v1016_v62  ;;  %v620_v0 = vsel %vm487_vm8, %v460_v11, -inf  ;;  %v628_v1 = vsel %vm600_vm6, %v461_v49, -inf  ;;  %v629_v6 = vsel %vm487_vm8, %v462_v20, -inf  ;;  %v637_v7 = vsel %vm600_vm6, %v463_v51, -inf }
  0x29   : > { %v604_v8 = vrot.slane %v603_v63, 4  ;;  %v613_v9 = vrot.slane %v612_v3, 4  ;;  %v621_v10 = vmax.f32 %v619_v4, %v620_v0  ;;  %v630_v12 = vmax.f32 %v628_v1, %v629_v6 }
  0x2a   : > { %v638_v2 = vsel %vm487_vm8, %v464_v22, -inf  ;;  %v646_v11 = vsel %vm600_vm6, %v465_v52, -inf  ;;  %v647_v14 = vsel %vm487_vm8, %v466_v23, -inf  ;;  %v655_v20 = vsel %vm600_vm6, %v467_v53, -inf }
  0x2b   : > { %v605_v13 = vmax.f32 %v603_v63, %v604_v8  ;;  %v614_v15 = vmax.f32 %v612_v3, %v613_v9  ;;  %v622_v16 = vrot.slane %v621_v10, 4  ;;  %v631_v25 = vrot.slane %v630_v12, 4 }
  0x2c   : > { %v639_v29 = vmax.f32 %v637_v7, %v638_v2  ;;  %v648_v17 = vmax.f32 %v646_v11, %v647_v14  ;;  %v656_v22 = vsel %vm487_vm8, %v468_v24, -inf  ;;  %v664_v18 = vsel %vm600_vm6, %v469_v56, -inf }
  0x2d   : > { %v606_v30 = vrot.slane %v605_v13, 2  ;;  %v615_v23 = vrot.slane %v614_v15, 2  ;;  %v623_v31 = vmax.f32 %v621_v10, %v622_v16  ;;  %v632_v35 = vmax.f32 %v630_v12, %v631_v25 }
  0x2e   : > { %v640_v36 = vrot.slane %v639_v29, 4  ;;  %v649_v37 = vrot.slane %v648_v17, 4  ;;  %v657_v38 = vmax.f32 %v655_v20, %v656_v22  ;;  %v665_v41 = vsel %vm487_vm8, %v470_v28, -inf }
  0x2f   : > { %v607_v42 = vmax.f32 %v605_v13, %v606_v30  ;;  %v616_v46 = vmax.f32 %v614_v15, %v615_v23  ;;  %v624_v19 = vrot.slane %v623_v31, 2  ;;  %v633_v47 = vrot.slane %v632_v35, 2 }
  0x30   : > { %v641_v24 = vmax.f32 %v639_v29, %v640_v36  ;;  %v650_v48 = vmax.f32 %v648_v17, %v649_v37  ;;  %v658_v50 = vrot.slane %v657_v38, 4  ;;  %v666_v54 = vmax.f32 %v664_v18, %v665_v41 }
  0x31   : > { %v608_v55 = vrot.slane %v607_v42, 1  ;;  %v617_v57 = vrot.slane %v616_v46, 1  ;;  %v625_v58 = vmax.f32 %v623_v31, %v624_v19  ;;  %v634_v59 = vmax.f32 %v632_v35, %v633_v47 }
  0x32   : > { %v642_v60 = vrot.slane %v641_v24, 2  ;;  %v651_v61 = vrot.slane %v650_v48, 2  ;;  %v659_v62 = vmax.f32 %v657_v38, %v658_v50  ;;  %v667_v63 = vrot.slane %v666_v54, 4 }
  0x33   : > { %v609_v3 = vmax.f32 %v607_v42, %v608_v55  ;;  %v618_v21 = vmax.f32 %v616_v46, %v617_v57  ;;  %v626_v4 = vrot.slane %v625_v58, 1  ;;  %v635_v28 = vrot.slane %v634_v59, 1 }
  0x34   : > { %v643_v0 = vmax.f32 %v641_v24, %v642_v60  ;;  %v652_v1 = vmax.f32 %v650_v48, %v651_v61  ;;  %v660_v6 = vrot.slane %v659_v62, 2  ;;  %v668_v7 = vmax.f32 %v666_v54, %v667_v63 }
  0x35   : > { %v627_v8 = vmax.f32 %v625_v58, %v626_v4  ;;  %v636_v9 = vmax.f32 %v634_v59, %v635_v28  ;;  %v884_v10 = vsel %vm883_vm1, %v618_v21, %v609_v3  ;;  %v488_v12 = vsel %vm487_vm8, %v455_v34, -inf  ;;  %v1655_v28 = vld [vmem:[%s1456_s9 + $0x4c] sm:$0x3] }
  0x36   : > { %v644_v2 = vrot.slane %v643_v0, 1  ;;  %v653_v11 = vrot.slane %v652_v1, 1  ;;  %v661_v14 = vmax.f32 %v659_v62, %v660_v6  ;;  %v669_v20 = vrot.slane %v668_v7, 2 }
  0x37   : > { %v886_v13 = vsel %vm885_vm2, %v627_v8, %v884_v10  ;;  %v489_v15 = vrot.slane %v488_v12, 4  ;;  %v495_v16 = vsel %vm487_vm8, %v457_v44, -inf  ;;  %v502_v25 = vsel %vm487_vm8, %v459_v45, -inf }
  0x38   : > { %v645_v29 = vmax.f32 %v643_v0, %v644_v2  ;;  %v654_v17 = vmax.f32 %v652_v1, %v653_v11  ;;  %v662_v5 = vrot.slane %v661_v14, 1  ;;  %v670_v22 = vmax.f32 %v668_v7, %v669_v20  ;;  %v1658_v0 = vld [vmem:[%s1456_s9 + $0x54] sm:$0x3]  ;;  %v1665_v2 = vld [vmem:[%s1456_s9 + $0x64] sm:$0x3] }
  0x39   : > { %v888_v34 = vsel %vm887_vm3, %v636_v9, %v886_v13  ;;  %v490_v18 = vmax.f32 %v488_v12, %v489_v15  ;;  %v496_v30 = vrot.slane %v495_v16, 4  ;;  %v503_v23 = vrot.slane %v502_v25, 4  ;;  %v1669_v20 = vld [vmem:[%s1456_s9 + $0x6c] sm:$0x3] }
  0x3a   : > { %v663_v31 = vmax.f32 %v661_v14, %v662_v5  ;;  %v671_v35 = vrot.slane %v670_v22, 1  ;;  %v890_v36 = vsel %vm889_vm4, %v645_v29, %v888_v34  ;;  %v509_v26 = vsel %vm487_vm8, %v461_v49, -inf  ;;  %v1674_v5 = vld [vmem:[%s1456_s9 + $0x74] sm:$0x3] }
  0x3b   : > { %v892_v27 = vsel %vm891_vm5, %v654_v17, %v890_v36  ;;  %v491_v44 = vrot.slane %v490_v18, 2  ;;  %v497_v45 = vmax.f32 %v495_v16, %v496_v30  ;;  %v504_v37 = vmax.f32 %v502_v25, %v503_v23 }
  0x3c   : > { %v672_v38 = vmax.f32 %v670_v22, %v671_v35  ;;  %v894_v41 = vsel %vm893_vm7, %v663_v31, %v892_v27  ;;  %v510_v42 = vrot.slane %v509_v26, 4  ;;  %v516_v46 = vsel %vm487_vm8, %v463_v51, -inf  ;;  %v1677_v22 = vld [vmem:[%s1456_s9 + $0x7c] sm:$0x3] }
  0x3d   : > { %v492_v19 = vmax.f32 %v490_v18, %v491_v44  ;;  %v498_v47 = vrot.slane %v497_v45, 2  ;;  %v505_v24 = vrot.slane %v504_v37, 2  ;;  %v517_v32 = vrot.slane %v516_v46, 4 }
  0x3e   : > { %v896_v49 = vsel %vm895_vm9, %v672_v38, %v894_v41  ;;  %v511_v48 = vmax.f32 %v509_v26, %v510_v42  ;;  %v523_v50 = vsel %vm487_vm8, %v465_v52, -inf  ;;  %v530_v54 = vsel %vm487_vm8, %v467_v53, -inf  ;;  %v1652_v52 = vld [vmem:[%s1456_s9 + $0x44] sm:$0x3] }
  0x3f   : > { %1313 = vmatmul.msk.f32.vlgmr.msra.gmra.mxu0 %vm904_vm10, %v896_v49  ;;  %v493_v33 = vrot.slane %v492_v19, 1  ;;  %v499_v51 = vmax.f32 %v497_v45, %v498_v47  ;;  %v506_v55 = vmax.f32 %v504_v37, %v505_v24  ;;  %v518_v57 = vmax.f32 %v516_v46, %v517_v32 }
  0x40   : > { %v512_v58 = vrot.slane %v511_v48, 2  ;;  %v524_v59 = vrot.slane %v523_v50, 4  ;;  %v531_v60 = vrot.slane %v530_v54, 4  ;;  %v537_v39 = vsel %vm487_vm8, %v469_v56, -inf  ;;  %v1661_v56 = vld [vmem:[%s1456_s9 + $0x5c] sm:$0x3] }
  0x41   : > { %v494_v40 = vmax.f32 %v492_v19, %v493_v33  ;;  %v500_v53 = vrot.slane %v499_v51, 1  ;;  %v507_v61 = vrot.slane %v506_v55, 1  ;;  %v519_v62 = vrot.slane %v518_v57, 2 }
  0x42   : > { %v513_v63 = vmax.f32 %v511_v48, %v512_v58  ;;  %v525_v3 = vmax.f32 %v523_v50, %v524_v59  ;;  %v532_v21 = vmax.f32 %v530_v54, %v531_v60  ;;  %v538_v4 = vrot.slane %v537_v39, 4 }
  0x43   : > { %v501_v43 = vmax.f32 %v499_v51, %v500_v53  ;;  %v508_v1 = vmax.f32 %v506_v55, %v507_v61  ;;  %v520_v6 = vmax.f32 %v518_v57, %v519_v62  ;;  %v472_v7 = vunpack.c.l.bf16 %v1652_v52 }
  0x44   : > { %v514_v8 = vrot.slane %v513_v63, 1  ;;  %v526_v9 = vrot.slane %v525_v3, 2  ;;  %v533_v10 = vrot.slane %v532_v21, 2  ;;  %v539_v12 = vmax.f32 %v537_v39, %v538_v4 }
  0x45   : > { %v521_v11 = vrot.slane %v520_v6, 1  ;;  %v948_v14 = vsel %vm883_vm1, %v501_v43, %v494_v40  ;;  %v474_v13 = vunpack.c.l.bf16 %v1655_v28  ;;  %v476_v15 = vunpack.c.l.bf16 %v1658_v0 }
  0x46   : > { %v515_v16 = vmax.f32 %v513_v63, %v514_v8  ;;  %v527_v25 = vmax.f32 %v525_v3, %v526_v9  ;;  %v534_v29 = vmax.f32 %v532_v21, %v533_v10  ;;  %v540_v17 = vrot.slane %v539_v12, 2 }
  0x47   : > { %v522_v34 = vmax.f32 %v520_v6, %v521_v11  ;;  %v949_v18 = vsel %vm885_vm2, %v508_v1, %v948_v14  ;;  %v478_v30 = vunpack.c.l.bf16 %v1661_v56  ;;  %v480_v23 = vunpack.c.l.bf16 %v1665_v2 }
  0x48   : > { %v528_v31 = vrot.slane %v527_v25, 1  ;;  %v535_v35 = vrot.slane %v534_v29, 1  ;;  %v541_v36 = vmax.f32 %v539_v12, %v540_v17  ;;  %v950_v26 = vsel %vm887_vm3, %v515_v16, %v949_v18 }
  0x49   : > { %v951_v27 = vsel %vm889_vm4, %v522_v34, %v950_v26  ;;  %v482_v44 = vunpack.c.l.bf16 %v1669_v20  ;;  %v484_v45 = vunpack.c.l.bf16 %v1674_v5  ;;  %v486_v37 = vunpack.c.l.bf16 %v1677_v22 }
  0x4a   : > { %v529_v38 = vmax.f32 %v527_v25, %v528_v31  ;;  %v536_v41 = vmax.f32 %v534_v29, %v535_v35  ;;  %v542_v42 = vrot.slane %v541_v36, 1  ;;  %v802_v46 = vsel %vm745_vm0, %v472_v7, -inf  ;;  %v1720_v35 = vld [vmem:[%s1456_s9 + $0x40] sm:$0xf] }
  0x4b   : > { %v803_v19 = vrot.slane %v802_v46, 4  ;;  %v809_v47 = vsel %vm745_vm0, %v474_v13, -inf  ;;  %v816_v24 = vsel %vm745_vm0, %v476_v15, -inf  ;;  %v823_v32 = vsel %vm745_vm0, %v478_v30, -inf }
  0x4c   : > { %v543_v49 = vmax.f32 %v541_v36, %v542_v42  ;;  %v952_v48 = vsel %vm891_vm5, %v529_v38, %v951_v27  ;;  %v810_v50 = vrot.slane %v809_v47, 4  ;;  %v817_v54 = vrot.slane %v816_v24, 4 }
  0x4d   : > { %v953_v33 = vsel %vm893_vm7, %v536_v41, %v952_v48  ;;  %v804_v51 = vmax.f32 %v802_v46, %v803_v19  ;;  %v824_v55 = vrot.slane %v823_v32, 4  ;;  %v830_v57 = vsel %vm745_vm0, %v480_v23, -inf  ;;  %v1723_v41 = vld [vmem:[%s1456_s9 + $0x48] sm:$0xf] }
  0x4e   : > { %v954_v58 = vsel %vm895_vm9, %v543_v49, %v953_v33  ;;  %v811_v59 = vmax.f32 %v809_v47, %v810_v50  ;;  %v818_v60 = vmax.f32 %v816_v24, %v817_v54  ;;  %v831_v39 = vrot.slane %v830_v57, 4  ;;  %v1726_v24 = vld [vmem:[%s1456_s9 + $0x50] sm:$0xf]  ;;  %v1729_v50 = vld [vmem:[%s1456_s9 + $0x58] sm:$0xf] }
  0x4f   : > { %1315 = vmatmul.msk.f32.vlgmr.msra.gmra.mxu1 %vm904_vm10, %v954_v58  ;;  %v805_v40 = vrot.slane %v804_v51, 2  ;;  %v825_v53 = vmax.f32 %v823_v32, %v824_v55  ;;  %v837_v61 = vsel %vm745_vm0, %v482_v44, -inf  ;;  %v844_v62 = vsel %vm745_vm0, %v484_v45, -inf  ;;  %v1732_v54 = vld [vmem:[%s1456_s9 + $0x60] sm:$0xf] }
  0x50   : > { %v812_v63 = vrot.slane %v811_v59, 2  ;;  %v819_v3 = vrot.slane %v818_v60, 2  ;;  %v832_v21 = vmax.f32 %v830_v57, %v831_v39  ;;  %v838_v4 = vrot.slane %v837_v61, 4  ;;  %v1737_v58 = vld [vmem:[%s1456_s9 + $0x68] sm:$0xf] }
  0x51   : > { %v806_v43 = vmax.f32 %v804_v51, %v805_v40  ;;  %v826_v1 = vrot.slane %v825_v53, 2  ;;  %v845_v6 = vrot.slane %v844_v62, 4  ;;  %v851_v8 = vsel %vm745_vm0, %v486_v37, -inf }
  0x52   : > { %v813_v9 = vmax.f32 %v811_v59, %v812_v63  ;;  %v820_v10 = vmax.f32 %v818_v60, %v819_v3  ;;  %v833_v12 = vrot.slane %v832_v21, 2  ;;  %v839_v11 = vmax.f32 %v837_v61, %v838_v4  ;;  %v1745_v61 = vld [vmem:[%s1456_s9 + $0x78] sm:$0xf] }
  0x53   : > { %v807_v14 = vrot.slane %v806_v43, 1  ;;  %v827_v16 = vmax.f32 %v825_v53, %v826_v1  ;;  %v846_v25 = vmax.f32 %v844_v62, %v845_v6  ;;  %v852_v29 = vrot.slane %v851_v8, 4  ;;  %v1742_v53 = vld [vmem:[%s1456_s9 + $0x70] sm:$0xf]  ;;  %s409_s9 = scalar_lea.vmem %s1893_s5, %s1339_s29 }
  0x54   : > { %v814_v17 = vrot.slane %v813_v9, 1  ;;  %v821_v34 = vrot.slane %v820_v10, 1  ;;  %v834_v18 = vmax.f32 %v832_v21, %v833_v12  ;;  %v840_v31 = vrot.slane %v839_v11, 2 }
  0x55   : > { %v808_v36 = vmax.f32 %v806_v43, %v807_v14  ;;  %v828_v26 = vrot.slane %v827_v16, 1  ;;  %v847_v27 = vrot.slane %v846_v25, 2  ;;  %v853_v38 = vmax.f32 %v851_v8, %v852_v29 }
  0x56   : > { %v815_v42 = vmax.f32 %v813_v9, %v814_v17  ;;  %v822_v46 = vmax.f32 %v820_v10, %v821_v34  ;;  %v835_v19 = vrot.slane %v834_v18, 1  ;;  %v841_v47 = vmax.f32 %v839_v11, %v840_v31 }
  0x57   : > { %v829_v32 = vmax.f32 %v827_v16, %v828_v26  ;;  %v848_v49 = vmax.f32 %v846_v25, %v847_v27  ;;  %v854_v48 = vrot.slane %v853_v38, 2  ;;  %v471_v33 = vunpack.c.l.bf16 %v1720_v35 }
  0x58   : > { %v836_v51 = vmax.f32 %v834_v18, %v835_v19  ;;  %v842_v55 = vrot.slane %v841_v47, 1  ;;  %v1017_v57 = vsel %vm883_vm1, %v815_v42, %v808_v36  ;;  %v473_v59 = vunpack.c.l.bf16 %v1723_v41 }
  0x59   : > { %v849_v60 = vrot.slane %v848_v49, 1  ;;  %v855_v39 = vmax.f32 %v853_v38, %v854_v48  ;;  %v1018_v40 = vsel %vm885_vm2, %v822_v46, %v1017_v57  ;;  %v475_v62 = vunpack.c.l.bf16 %v1726_v24 }
  0x5a   : > { %v843_v63 = vmax.f32 %v841_v47, %v842_v55  ;;  %v1019_v3 = vsel %vm887_vm3, %v829_v32, %v1018_v40  ;;  %v477_v21 = vunpack.c.l.bf16 %v1729_v50  ;;  %v479_v4 = vunpack.c.l.bf16 %v1732_v54 }
  0x5b   : > { %v850_v43 = vmax.f32 %v848_v49, %v849_v60  ;;  %v856_v1 = vrot.slane %v855_v39, 1  ;;  %v1020_v6 = vsel %vm889_vm4, %v836_v51, %v1019_v3  ;;  %v481_v8 = vunpack.c.l.bf16 %v1737_v58 }
  0x5c   : > { %v1021_v9 = vsel %vm891_vm5, %v843_v63, %v1020_v6  ;;  %v483_v10 = vunpack.c.l.bf16 %v1742_v53  ;;  %v485_v12 = vunpack.c.l.bf16 %v1745_v61  ;;  %v673_v11 = vsel %vm600_vm6, %v471_v33, -inf }
  0x5d   : > { %v857_v14 = vmax.f32 %v855_v39, %v856_v1  ;;  %v1022_v16 = vsel %vm893_vm7, %v850_v43, %v1021_v9  ;;  %v674_v25 = vsel %vm487_vm8, %v472_v7, -inf  ;;  %v682_v29 = vsel %vm600_vm6, %v473_v59, -inf }
  0x5e   : > { %v675_v17 = vmax.f32 %v673_v11, %v674_v25  ;;  %v683_v34 = vsel %vm487_vm8, %v474_v13, -inf  ;;  %v691_v18 = vsel %vm600_vm6, %v475_v62, -inf  ;;  %v692_v31 = vsel %vm487_vm8, %v476_v15, -inf }
  0x5f   : > { %v1023_v52 = vsel %vm895_vm9, %v857_v14, %v1022_v16  ;;  %v684_v7 = vmax.f32 %v682_v29, %v683_v34  ;;  %v693_v36 = vmax.f32 %v691_v18, %v692_v31  ;;  %v700_v26 = vsel %vm600_vm6, %v477_v21, -inf }
  0x60   : > { %1322 = vmatmul.msk.f32.gmra.mxu2 %vm904_vm10, %v1023_v52  ;;  %v676_v28 = vrot.slane %v675_v17, 4  ;;  %v701_v13 = vsel %vm487_vm8, %v478_v30, -inf  ;;  %v709_v0 = vsel %vm600_vm6, %v479_v4, -inf  ;;  %v710_v15 = vsel %vm487_vm8, %v480_v23, -inf }
  0x61   : > { %v685_v27 = vrot.slane %v684_v7, 4  ;;  %v694_v38 = vrot.slane %v693_v36, 4  ;;  %v702_v42 = vmax.f32 %v700_v26, %v701_v13  ;;  %v711_v46 = vmax.f32 %v709_v0, %v710_v15 }
  0x62   : > { %v677_v19 = vmax.f32 %v675_v17, %v676_v28  ;;  %v718_v47 = vsel %vm600_vm6, %v481_v8, -inf  ;;  %v719_v56 = vsel %vm487_vm8, %v482_v44, -inf  ;;  %v727_v30 = vsel %vm600_vm6, %v483_v10, -inf }
  0x63   : > { %v686_v2 = vmax.f32 %v684_v7, %v685_v27  ;;  %v695_v32 = vmax.f32 %v693_v36, %v694_v38  ;;  %v703_v23 = vrot.slane %v702_v42, 4  ;;  %v712_v49 = vrot.slane %v711_v46, 4 }
  0x64   : > { %v678_v48 = vrot.slane %v677_v19, 2  ;;  %v720_v51 = vmax.f32 %v718_v47, %v719_v56  ;;  %v728_v55 = vsel %vm487_vm8, %v484_v45, -inf  ;;  %v736_v20 = vsel %vm600_vm6, %v485_v12, -inf }
  0x65   : > { %v687_v57 = vrot.slane %v686_v2, 2  ;;  %v696_v44 = vrot.slane %v695_v32, 2  ;;  %v704_v60 = vmax.f32 %v702_v42, %v703_v23  ;;  %v713_v39 = vmax.f32 %v711_v46, %v712_v49 }
  0x66   : > { %v679_v40 = vmax.f32 %v677_v19, %v678_v48  ;;  %v721_v63 = vrot.slane %v720_v51, 4  ;;  %v729_v3 = vmax.f32 %v727_v30, %v728_v55  ;;  %v737_v43 = vsel %vm487_vm8, %v486_v37, -inf }
  0x67   : > { %v688_v1 = vmax.f32 %v686_v2, %v687_v57  ;;  %v697_v6 = vmax.f32 %v695_v32, %v696_v44  ;;  %v705_v5 = vrot.slane %v704_v60, 2  ;;  %v714_v9 = vrot.slane %v713_v39, 2 }
  0x68   : > { %v680_v45 = vrot.slane %v679_v40, 1  ;;  %v722_v11 = vmax.f32 %v720_v51, %v721_v63  ;;  %v730_v14 = vrot.slane %v729_v3, 4  ;;  %v738_v16 = vmax.f32 %v736_v20, %v737_v43 }
  0x69   : > { %v689_v25 = vrot.slane %v688_v1, 1  ;;  %v698_v29 = vrot.slane %v697_v6, 1  ;;  %v706_v17 = vmax.f32 %v704_v60, %v705_v5  ;;  %v715_v34 = vmax.f32 %v713_v39, %v714_v9 }
  0x6a   : > { %v681_v18 = vmax.f32 %v679_v40, %v680_v45  ;;  %v723_v31 = vrot.slane %v722_v11, 2  ;;  %v731_v52 = vmax.f32 %v729_v3, %v730_v14  ;;  %v739_v7 = vrot.slane %v738_v16, 4 }
  0x6b   : > { %v690_v36 = vmax.f32 %v688_v1, %v689_v25  ;;  %v699_v22 = vmax.f32 %v697_v6, %v698_v29  ;;  %v707_v26 = vrot.slane %v706_v17, 1  ;;  %v716_v37 = vrot.slane %v715_v34, 1 }
  0x6c   : > { %v724_v28 = vmax.f32 %v722_v11, %v723_v31  ;;  %v732_v13 = vrot.slane %v731_v52, 2  ;;  %v740_v0 = vmax.f32 %v738_v16, %v739_v7  ;;  %v544_v15 = vsel %vm487_vm8, %v471_v33, -inf }
  0x6d   : > { %v708_v27 = vmax.f32 %v706_v17, %v707_v26  ;;  %v717_v38 = vmax.f32 %v715_v34, %v716_v37  ;;  %v897_v42 = vsel %vm883_vm1, %v690_v36, %v681_v18  ;;  %v545_v46 = vrot.slane %v544_v15, 4 }
  0x6e   : > { %v725_v19 = vrot.slane %v724_v28, 1  ;;  %v733_v47 = vmax.f32 %v731_v52, %v732_v13  ;;  %v741_v56 = vrot.slane %v740_v0, 2  ;;  %v898_v30 = vsel %vm885_vm2, %v699_v22, %v897_v42 }
  0x6f   : > { %v899_v2 = vsel %vm887_vm3, %v708_v27, %v898_v30  ;;  %v546_v32 = vmax.f32 %v544_v15, %v545_v46  ;;  %v551_v23 = vsel %vm487_vm8, %v473_v59, -inf  ;;  %v558_v35 = vsel %vm487_vm8, %v475_v62, -inf }
  0x70   : > { %v726_v33 = vmax.f32 %v724_v28, %v725_v19  ;;  %v734_v49 = vrot.slane %v733_v47, 1  ;;  %v742_v48 = vmax.f32 %v740_v0, %v741_v56  ;;  %v900_v51 = vsel %vm889_vm4, %v717_v38, %v899_v2 }
  0x71   : > { %v547_v55 = vrot.slane %v546_v32, 2  ;;  %v552_v20 = vrot.slane %v551_v23, 4  ;;  %v559_v57 = vrot.slane %v558_v35, 4  ;;  %v565_v44 = vsel %vm487_vm8, %v477_v21, -inf }
  0x72   : > { %v735_v60 = vmax.f32 %v733_v47, %v734_v49  ;;  %v743_v41 = vrot.slane %v742_v48, 1  ;;  %v901_v59 = vsel %vm891_vm5, %v726_v33, %v900_v51  ;;  %v566_v39 = vrot.slane %v565_v44, 4 }
  0x73   : > { %v548_v24 = vmax.f32 %v546_v32, %v547_v55  ;;  %v553_v40 = vmax.f32 %v551_v23, %v552_v20  ;;  %v560_v62 = vmax.f32 %v558_v35, %v559_v57  ;;  %v572_v63 = vsel %vm487_vm8, %v479_v4, -inf  ;;  %v1064_v55 = vld [vmem:[%s401_s22 + $0x18] sm:$0xff]  ;;  %v1063_v20 = vld [vmem:[%s401_s22 + $0x10] sm:$0xff]  ;;  %v1062_v57 = vld [vmem:[%s401_s22 + $0x8] sm:$0xff] }
  0x74   : > { %v744_v3 = vmax.f32 %v742_v48, %v743_v41  ;;  %v902_v43 = vsel %vm893_vm7, %v735_v60, %v901_v59  ;;  %v567_v1 = vmax.f32 %v565_v44, %v566_v39  ;;  %v573_v6 = vrot.slane %v572_v63, 4  ;;  %1087 = vmatpush.msra.mxu3 %v1064_v55 }
  0x75   : > { %v549_v50 = vrot.slane %v548_v24, 1  ;;  %v554_v5 = vrot.slane %v553_v40, 2  ;;  %v561_v21 = vrot.slane %v560_v62, 2  ;;  %v579_v9 = vsel %vm487_vm8, %v481_v8, -inf }
  0x76   : > { %v903_v45 = vsel %vm895_vm9, %v744_v3, %v902_v43  ;;  %v568_v11 = vrot.slane %v567_v1, 2  ;;  %v574_v14 = vmax.f32 %v572_v63, %v573_v6  ;;  %v580_v16 = vrot.slane %v579_v9, 4  ;;  %1088 = vmatpush.msra.mxu3 %v1063_v20  ;;  %v1061_v63 = vld [vmem:[%s401_s22] sm:$0xff]  ;;  %v1105_v3 = vld [vmem:[%s409_s9 + $0x28] sm:$0xff] }
  0x77   : > { %1314 = vmatmul.msk.f32.gmra.mxu0 %vm904_vm10, %v903_v45  ;;  %v555_v54 = vmax.f32 %v553_v40, %v554_v5  ;;  %v562_v4 = vmax.f32 %v560_v62, %v561_v21  ;;  %v586_v25 = vsel %vm487_vm8, %v483_v10, -inf  ;;  %v550_v58 = vmax.f32 %v548_v24, %v549_v50  ;;  %v1364_v24 = vld [vmem:[%s396_s15] ss:$0 sm:$0xff]  ;;  %1332 = vmatpush.msrb.mxu1 %v1105_v3  ;;  %s1331_s15 = sshll.u32 %s1901_s24, 4 }
  0x78   : > { %v569_v29 = vmax.f32 %v567_v1, %v568_v11  ;;  %v575_v17 = vrot.slane %v574_v14, 2  ;;  %v581_v34 = vmax.f32 %v579_v9, %v580_v16  ;;  %v587_v18 = vrot.slane %v586_v25, 4  ;;  %1089 = vmatpush.msra.mxu3 %v1062_v57  ;;  %v1104_v43 = vld [vmem:[%s409_s9 + $0x20] sm:$0xff]  ;;  %1127 = vmatpush.msrb.mxu0 %v1105_v3  ;;  %v1103_v1 = vld [vmem:[%s409_s9 + $0x18] sm:$0xff]  ;;  %v1101_v16 = vld [vmem:[%s409_s9 + $0x8] sm:$0xff]  ;;  %s421_s19 = scalar_lea.vmem %s1895_s7, %s1331_s15 }
  0x79   : > { %v556_v31 = vrot.slane %v555_v54, 1  ;;  %v563_v8 = vrot.slane %v562_v4, 1  ;;  %v593_v52 = vsel %vm487_vm8, %v485_v12, -inf  ;;  %1333 = vmatpush.msrb.mxu1 %v1104_v43 }
  0x7a   : > { %v570_v7 = vrot.slane %v569_v29, 1  ;;  %v576_v36 = vmax.f32 %v574_v14, %v575_v17  ;;  %v582_v22 = vrot.slane %v581_v34, 2  ;;  %v588_v26 = vmax.f32 %v586_v25, %v587_v18  ;;  %1090 = vmatpush.msra.mxu3 %v1061_v63  ;;  %1128 = vmatpush.msrb.mxu0 %v1104_v43  ;;  %v1102_v14 = vld [vmem:[%s409_s9 + $0x10] sm:$0xff] }
  0x7b   : > { %v557_v37 = vmax.f32 %v555_v54, %v556_v31  ;;  %v564_v28 = vmax.f32 %v562_v4, %v563_v8  ;;  %v594_v53 = vrot.slane %v593_v52, 4  ;;  %1334 = vmatpush.msrb.mxu1 %v1103_v1  ;;  %v1100_v54 = vld [vmem:[%s409_s9] sm:$0xff] }
  0x7c   : > { %v571_v13 = vmax.f32 %v569_v29, %v570_v7  ;;  %v577_v10 = vrot.slane %v576_v36, 1  ;;  %v583_v0 = vmax.f32 %v581_v34, %v582_v22  ;;  %v589_v15 = vrot.slane %v588_v26, 2  ;;  %1129 = vmatpush.msrb.mxu0 %v1103_v1  ;;  %v1365_v4 = vld [vmem:[%s404_s18] ss:$0 sm:$0xff] }
  0x7d   : > { %v595_v27 = vmax.f32 %v593_v52, %v594_v53  ;;  %v955_v38 = vsel %vm883_vm1, %v557_v37, %v550_v58  ;;  %1335 = vmatpush.msrb.mxu1 %v1102_v14  ;;  %v1366_v31 = vld [vmem:[%s412_s12] ss:$0 sm:$0xff] }
  0x7e   : > { %v578_v42 = vmax.f32 %v576_v36, %v577_v10  ;;  %v584_v46 = vrot.slane %v583_v0, 1  ;;  %v590_v61 = vmax.f32 %v588_v26, %v589_v15  ;;  %v956_v12 = vsel %vm885_vm2, %v564_v28, %v955_v38  ;;  %1130 = vmatpush.msrb.mxu0 %v1102_v14 }
  0x7f   : > { %v596_v19 = vrot.slane %v595_v27, 2  ;;  %v957_v47 = vsel %vm887_vm3, %v571_v13, %v956_v12  ;;  %1336 = vmatpush.msrb.mxu1 %v1101_v16 }
  0x80   : > { %v585_v56 = vmax.f32 %v583_v0, %v584_v46  ;;  %v591_v30 = vrot.slane %v590_v61, 1  ;;  %v958_v2 = vsel %vm889_vm4, %v578_v42, %v957_v47  ;;  %1131 = vmatpush.msrb.mxu0 %v1101_v16 }
  0x81   : > { %v597_v32 = vmax.f32 %v595_v27, %v596_v19  ;;  %1337 = vmatpush.msrb.mxu1 %v1100_v54 }
  0x82   : > { %v592_v23 = vmax.f32 %v590_v61, %v591_v30  ;;  %v959_v35 = vsel %vm891_vm5, %v585_v56, %v958_v2  ;;  %1132 = vmatpush.msrb.mxu0 %v1100_v54 }
  0x83   : > { %v598_v33 = vrot.slane %v597_v32, 1 }
  0x84   : > { %v960_v49 = vsel %vm893_vm7, %v592_v23, %v959_v35 }
  0x85   : > { %v599_v48 = vmax.f32 %v597_v32, %v598_v33 }
  0x87   : > { %v961_v51 = vsel %vm895_vm9, %v599_v48, %v960_v49 }
  0x88   : > { %1316 = vmatmul.msk.f32.gmra.mxu1 %vm904_vm10, %v961_v51 }
  0xab   : > { %v1045_v59 = vpop.f32.mrf.mxu2 }
  0xbc   : > { %v926_v44 = vpop.f32.mrf.mxu0 }
  0xcc   : > { %v983_v60 = vpop.f32.mrf.mxu1 }
  0xcd   : > { %v984_v41 = vadd.f32 %v983_v60, %v926_v44 }
  0xcf   : > { %v1051_v39 = vadd.f32 %v1045_v59, %v984_v41 }
  0xd1   : > { %v1057_v40 = vadd.f32 %v1364_v24, %v1051_v39 }
  0xd3   : > { %v1059_v62 = vmax.f32 %v1057_v40, 0.0 }
  0xd5   : > { %1323 = vmatmul.msk.f32.vlgmr.msra.gmra.mxu3 %vm904_vm10, %v1059_v62 }
  0xe3   : > { %v1048_v5 = vpop.f32.mrf.mxu2 }
  0xf4   : > { %v929_v6 = vpop.f32.mrf.mxu0 }
 0x105   : > { %v986_v50 = vpop.f32.mrf.mxu1 }
 0x106   : > { %v987_v21 = vadd.f32 %v986_v50, %v929_v6 }
 0x108   : > { %v1052_v9 = vadd.f32 %v1048_v5, %v987_v21 }
 0x10a   : > { %v1058_v45 = vadd.f32 %v1364_v24, %v1052_v9 }
 0x10c   : > { %v1060_v11 = vmax.f32 %v1058_v45, 0.0 }
 0x10e   : > { %1324 = vmatmul.msk.f32.gmra.mxu3 %vm904_vm10, %v1060_v11 }
 0x158   : > { %v1092_v25 = vpop.f32.mrf.mxu3 }
 0x159   : > { %v1093_v29 = vadd.f32 %v1365_v4, %v1092_v25 }
 0x15b   : > { %v1098_v17 = vmax.f32 %v1093_v29, 0.0 }
 0x15d   : > { %1325 = vmatmul.msk.f32.vlgmr.msrb.gmra.mxu0 %vm1110_vm11, %v1098_v17 }
 0x191   : > { %v1095_v34 = vpop.f32.mrf.mxu3 }
 0x192   : > { %v1096_v18 = vadd.f32 %v1365_v4, %v1095_v34 }
 0x194   : > { %v1099_v58 = vmax.f32 %v1096_v18, 0.0 }
 0x196   : > { %1326 = vmatmul.msk.f32.vlgmr.msrb.gmra.mxu1 %vm1110_vm11, %v1099_v58 }
 0x1da   : > { %v1134_v8 = vpop.f32.mrf.mxu0 }
 0x1db   : > { %v1135_v52 = vadd.f32 %v1366_v31, %v1134_v8 }
 0x1dd   : > { %1141 = vst.msk [vmem:[%s421_s19] sm:$0xff] %vm1140_vm12, %v1135_v52 }
 0x213   : > { %v1137_v7 = vpop.f32.mrf.mxu1 }
 0x214   : > { %v1138_v36 = vadd.f32 %v1366_v31, %v1137_v7 }
 0x216   : > { %1142 = vst.msk [vmem:[%s421_s19 + $0x8] sm:$0xff] %vm1140_vm12, %v1138_v36 }
 0x217 PF: > { %s17_s26 = sadd.s32 1, %s1389_s26   ;;  %s1896_s24 = smov %s1385_s25 }
 0x218   : > { %p14_p5 = scmp.ge.s32.totalorder %s17_s26, 4   ;;  %s1897_s25 = smov %s1899_s27 }
 0x21a   :  { %16 = sbr.rel (!%p14_p5) target bundleno = 2 (0x2), region = 98 }

</bundles_post_ra>
